<compile_context>
chip_gen: v6e
topology: v6e:2x2x1
jax: 0.10.0
libtpu: 0.0.40
codegen_flags: <defaults>
</compile_context>

<pallas_src>
import jax
import jax.numpy as jnp
from jax.experimental import pallas as pl
from jax.experimental.pallas import tpu as pltpu


def _round_up(x, m):
    return ((x + m - 1) // m) * m


def _cdiv(a, b):
    return (a + b - 1) // b


# ----------------------------- kernels --------------------------------------

def _fc_relu_fullk_kernel(x_ref, w_ref, b_ref, o_ref):
    # x_ref: (tm, K)  w_ref: (K, tn)  b_ref: (1, tn) f32  o_ref: (tm, tn)
    acc = jnp.dot(x_ref[...], w_ref[...], preferred_element_type=jnp.float32)
    o_ref[...] = jnp.maximum(acc + b_ref[...], 0.0).astype(o_ref.dtype)


def _fc_relu_splitk_kernel(x_ref, w_ref, b_ref, o_ref, acc_ref):
    # x_ref: (tm, tk)  w_ref: (tk, tn)  b_ref: (1, tn) f32  o_ref: (tm, tn)
    k = pl.program_id(2)

    @pl.when(k == 0)
    def _():
        acc_ref[...] = jnp.zeros_like(acc_ref)

    acc_ref[...] += jnp.dot(x_ref[...], w_ref[...],
                            preferred_element_type=jnp.float32)

    @pl.when(k == pl.num_programs(2) - 1)
    def _():
        o_ref[...] = jnp.maximum(acc_ref[...] + b_ref[...], 0.0).astype(o_ref.dtype)


# ----------------------------- wrapper ---------------------------------------

_DEFAULT_FULLK_BYTES = 26 * 1024 * 1024   # conservative: fits v7x's 64 MiB VMEM
_VMEM_CAP_BYTES = 48 * 1024 * 1024        # never request more than this


def fc_relu(x, w, b, *, compute_dtype=jnp.bfloat16,
            max_fullk_bytes=_DEFAULT_FULLK_BYTES):
    """relu(x @ w + b). x: [M, K], w: [K, N] (nn.Linear weight transposed), b: [N]."""
    M, K = x.shape
    Kw, N = w.shape
    assert K == Kw and b.shape == (N,)
    out_dtype = x.dtype

    if compute_dtype is not None and x.dtype != compute_dtype:
        x = x.astype(compute_dtype)
    if compute_dtype is not None and w.dtype != compute_dtype:
        # TODO(synk): pre-cast (and pre-pad) W once at parameter-load time so
        # this full-HBM astype pass does not run on every call.
        w = w.astype(compute_dtype)

    cb = jnp.dtype(x.dtype).itemsize          # matmul operand bytes
    ob = jnp.dtype(out_dtype).itemsize        # output bytes
    sub = {4: 8, 2: 16, 1: 32}[cb]            # min sublane tile for this dtype

    # Lane-dense output tile (multiple of 128).
    tn = min(512, _round_up(N, 128))

    # Prefer the full-K (2-D grid, no accumulator) path when the
    # double-buffered x-stripe + W-tile footprint fits the VMEM budget.
    def fullk_bytes(tm_, tn_):
        return 2 * (tm_ * K * cb + K * tn_ * cb + tn_ * 4 + tm_ * tn_ * ob)

    tm = None
    use_fullk = False
    for cand in (1024, 512, 256):
        t = min(cand, _round_up(M, sub))
        if fullk_bytes(t, tn) <= max_fullk_bytes:
            tm, use_fullk = t, True
            break
    if not use_fullk:
        tm = min(512, _round_up(M, sub))

    # Keep both v7x TensorCores busy: if there is only a single (i, j) block,
    # split N into at least two column blocks.
    if _cdiv(M, tm) == 1 and _cdiv(N, tn) == 1 and N >= 256:
        tn = max(128, _round_up(_cdiv(N, 2), 128))

    Mp, Np = _round_up(M, tm), _round_up(N, tn)

    if use_fullk:
        tk = K
        Kp = K                                    # no K padding needed
    else:
        tk = min(2048 if cb == 2 else 1024, _round_up(K, 128))
        Kp = _round_up(K, tk)

    # Pad only when ragged (aligned hot path does zero extra HBM passes).
    if (Mp, Kp) != (M, K):
        x = jnp.pad(x, ((0, Mp - M), (0, Kp - K)))
    if (Kp, Np) != (K, N):
        w = jnp.pad(w, ((0, Kp - K), (0, Np - N)))
    b2 = b.astype(jnp.float32)
    if Np != N:
        b2 = jnp.pad(b2, (0, Np - N))
    b2 = b2.reshape(1, Np)

    cost = pl.CostEstimate(
        flops=2 * M * K * N,
        transcendentals=0,
        bytes_accessed=M * K * cb + K * N * cb + N * 4 + M * N * ob,
    )

    if use_fullk:
        grid = (Mp // tm, Np // tn)   # j innermost: x stripe resident across N blocks
        needed = fullk_bytes(tm, tn)
        in_specs = [
            pl.BlockSpec((tm, Kp), lambda i, j: (i, 0)),   # x row-stripe
            pl.BlockSpec((Kp, tn), lambda i, j: (0, j)),   # full-K W tile
            pl.BlockSpec((1, tn), lambda i, j: (0, j)),    # bias tile (f32)
        ]
        out_specs = pl.BlockSpec((tm, tn), lambda i, j: (i, j))
        scratch_shapes = []
        kernel = _fc_relu_fullk_kernel
        dims = ("parallel", "parallel")
    else:
        grid = (Mp // tm, Np // tn, Kp // tk)
        needed = (2 * (tm * tk * cb + tk * tn * cb + tn * 4 + tm * tn * ob)
                  + tm * tn * 4)
        in_specs = [
            pl.BlockSpec((tm, tk), lambda i, j, k: (i, k)),   # x tile
            pl.BlockSpec((tk, tn), lambda i, j, k: (k, j)),   # W tile
            pl.BlockSpec((1, tn), lambda i, j, k: (0, j)),    # bias tile (f32)
        ]
        out_specs = pl.BlockSpec((tm, tn), lambda i, j, k: (i, j))
        scratch_shapes = [pltpu.VMEM((tm, tn), jnp.float32)]
        kernel = _fc_relu_splitk_kernel
        dims = ("parallel", "parallel", "arbitrary")

    vmem_limit = int(min(max(needed + (4 << 20), 32 << 20), _VMEM_CAP_BYTES))

    out_p = pl.pallas_call(
        kernel,
        out_shape=jax.ShapeDtypeStruct((Mp, Np), out_dtype),
        grid_spec=pltpu.PrefetchScalarGridSpec(
            num_scalar_prefetch=0,
            grid=grid,
            in_specs=in_specs,
            out_specs=out_specs,
            scratch_shapes=scratch_shapes,
        ),
        compiler_params=pltpu.CompilerParams(
            dimension_semantics=dims,
            vmem_limit_bytes=vmem_limit,
        ),
        cost_estimate=cost,
    )(x, w, b2)

    if (Mp, Np) != (M, N):
        out_p = out_p[:M, :N]
    return out_p


if __name__ == "__main__":
    key = jax.random.PRNGKey(0)
    kx, kw, kb = jax.random.split(key, 3)

    # Small deterministic setup: batch=16, in_dim=32, out_dim=64.
    batch, in_dim, out_dim = 16, 32, 64
    x = jax.random.normal(kx, (batch, in_dim), dtype=jnp.float32)
    # nn.Linear weight is [out_dim, in_dim]; we store its transpose [in_dim, out_dim].
    w_t = jax.random.normal(kw, (in_dim, out_dim), dtype=jnp.float32) * 0.1
    b = jax.random.normal(kb, (out_dim,), dtype=jnp.float32) * 0.1
    ref = jnp.maximum(x @ w_t + b, 0.0)

    # 1) Default path: bf16 MXU operands, f32 accumulation, full-K 2-D grid.
    out = jax.block_until_ready(fc_relu(x, w_t, b))
    assert out.shape == (batch, out_dim)
    assert jnp.allclose(out, ref, atol=5e-2, rtol=5e-2)

    # 2) f32 operand path (tight tolerance).
    out32 = jax.block_until_ready(fc_relu(x, w_t, b, compute_dtype=jnp.float32))
    assert jnp.allclose(out32, ref, atol=1e-5, rtol=1e-5)

    # 3) Ragged shapes exercise the pad/slice fallback path.
    xr, wr, br = x[:13, :30], w_t[:30, :50], b[:50]
    out_r = jax.block_until_ready(fc_relu(xr, wr, br, compute_dtype=jnp.float32))
    ref_r = jnp.maximum(xr @ wr + br, 0.0)
    assert out_r.shape == (13, 50)
    assert jnp.allclose(out_r, ref_r, atol=1e-5, rtol=1e-5)

    # 4) Aligned larger case (exercises tiling + 2-TensorCore N split), bf16.
    kx2, kw2, kb2 = jax.random.split(jax.random.PRNGKey(1), 3)
    M2, K2, N2 = 128, 256, 256
    x2 = jax.random.normal(kx2, (M2, K2), dtype=jnp.float32)
    w2 = jax.random.normal(kw2, (K2, N2), dtype=jnp.float32) * 0.1
    b2_ = jax.random.normal(kb2, (N2,), dtype=jnp.float32) * 0.1
    ref2 = jnp.maximum(x2 @ w2 + b2_, 0.0)
    out2 = jax.block_until_ready(fc_relu(x2, w2, b2_))
    assert out2.shape == (M2, N2)
    assert jnp.allclose(out2, ref2, atol=1e-1, rtol=1e-1)

    # 5) Force the split-K accumulator path (K grid axis + f32 VMEM scratch).
    out_sk = jax.block_until_ready(
        fc_relu(x, w_t, b, compute_dtype=jnp.float32, max_fullk_bytes=0))
    assert jnp.allclose(out_sk, ref, atol=1e-5, rtol=1e-5)

    print("KERNEL_OK")
</pallas_src>

<mosaic_0001>
module attributes {stable_mosaic.version = 11 : i64} {
  func.func @_fc_relu_fullk_kernel(%arg0: i32, %arg1: i32, %arg2: memref<16x32xbf16, #tpu.memory_space<vmem>>, %arg3: memref<32x128xbf16, #tpu.memory_space<vmem>>, %arg4: memref<1x128xf32, #tpu.memory_space<vmem>>, %arg5: memref<16x128xf32, #tpu.memory_space<vmem>>) attributes {dimension_semantics = [#tpu.dimension_semantics<parallel>, #tpu.dimension_semantics<parallel>], iteration_bounds = array<i64: 1, 1>, scalar_prefetch = 0 : i64, scratch_operands = 0 : i64, tpu.core_type = #tpu.core_type<tc>, window_params = [{transform_indices = @transform_0, window_bounds = array<i64: 16, 32>}, {transform_indices = @transform_1, window_bounds = array<i64: 32, 128>}, {transform_indices = @transform_2, window_bounds = array<i64: 1, 128>}, {transform_indices = @transform_3, window_bounds = array<i64: 16, 128>}]} {
    %c0 = arith.constant 0 : index
    %c0_0 = arith.constant 0 : index
    %0 = vector.load %arg2[%c0, %c0_0] : memref<16x32xbf16, #tpu.memory_space<vmem>>, vector<16x32xbf16>
    %c0_1 = arith.constant 0 : index
    %c0_2 = arith.constant 0 : index
    %1 = vector.load %arg3[%c0_1, %c0_2] : memref<32x128xbf16, #tpu.memory_space<vmem>>, vector<32x128xbf16>
    %cst = arith.constant dense<0.000000e+00> : vector<16x128xf32>
    %2 = tpu.matmul %0, %1, %cst {dimension_numbers = #tpu.dot_dimension_numbers<[1], [0], [0], [1], [0, 0, 1, 1], [], []>} : vector<16x32xbf16>, vector<32x128xbf16>, vector<16x128xf32> -> vector<16x128xf32>
    %c0_3 = arith.constant 0 : index
    %c0_4 = arith.constant 0 : index
    %3 = vector.load %arg4[%c0_3, %c0_4] : memref<1x128xf32, #tpu.memory_space<vmem>>, vector<1x128xf32>
    %4 = vector.broadcast %3 : vector<1x128xf32> to vector<16x128xf32>
    %5 = arith.addf %2, %4 : vector<16x128xf32>
    %cst_5 = arith.constant 0.000000e+00 : f32
    %6 = vector.broadcast %cst_5 : f32 to vector<16x128xf32>
    %7 = arith.maximumf %5, %6 : vector<16x128xf32>
    %c0_6 = arith.constant 0 : index
    %c0_7 = arith.constant 0 : index
    %8 = vector.load %arg5[%c0_6, %c0_7] : memref<16x128xf32, #tpu.memory_space<vmem>>, vector<16x128xf32>
    tpu.vector_store %arg5[%c0_6, %c0_7], %7 {strides = array<i32>} : memref<16x128xf32, #tpu.memory_space<vmem>>, vector<16x128xf32>,
    return
  }
  func.func @transform_0(%arg0: i32, %arg1: i32) -> (i32, i32) {
    %c0_i32 = arith.constant 0 : i32
    %c0_i32_0 = arith.constant 0 : i32
    return %arg0, %c0_i32 : i32, i32
  }
  func.func @transform_1(%arg0: i32, %arg1: i32) -> (i32, i32) {
    %c0_i32 = arith.constant 0 : i32
    %c0_i32_0 = arith.constant 0 : i32
    return %c0_i32, %arg1 : i32, i32
  }
  func.func @transform_2(%arg0: i32, %arg1: i32) -> (i32, i32) {
    %c0_i32 = arith.constant 0 : i32
    %c0_i32_0 = arith.constant 0 : i32
    return %c0_i32, %arg1 : i32, i32
  }
  func.func @transform_3(%arg0: i32, %arg1: i32) -> (i32, i32) {
    %c0_i32 = arith.constant 0 : i32
    return %arg0, %arg1 : i32, i32
  }
}

</mosaic_0001>

<bundles_post_ra>
// kernel: tpu_custom_call.1
= control target key start
LH: loop header
LB: loop body
LE: loop exit
PB: predicated region body
PF: predicated region fallthrough
CT: control target
= control target key end

     0   :  { %8 = vsyncpa [#allocation3], 0  ;;  %s276_s0 = inlined_call_operand.hbm [shape: bf16[16,32], index: 0, kind: input, shape index: {}]   ;;  %s277_s1 = inlined_call_operand.hbm [shape: bf16[32,128], index: 1, kind: input, shape index: {}]   ;;  %s278_s2 = inlined_call_operand.vmem [shape: f32[1,128], index: 2, kind: input, shape index: {}]   ;;  %s279_s3 = inlined_call_operand.hbm [shape: f32[16,128], index: 3, kind: output, shape index: {}]  }
   0x1   :  { %9 = vsyncpa [#allocation6], 0 }
   0x2   :  { %10 = vsyncpa [#allocation4], 0  ;;  %s235_s12 = smov [#allocation2]  }
   0x3   :  { %s16_s13 = sshll.u32 %s235_s12, 4  ;;  %s17_s13 = int_to_ptr.vmem [resolvable:$true] %s16_s13 }
   0x4   :  { %s177_s14 = scalar_lea.vmem %s17_s13, 128  ;;  %p182_p1 = scmp.lt.s32.totalorder %s17_s13, %s17_s13 }
   0x5   :  { %p178_p0 = scmp.ne.s32.totalorder %s17_s13, %s177_s14  ;;  %p183_p2 = scmp.lt.s32.totalorder %s177_s14, %s177_s14 }
   0x7   :  { %p184_p3 = por %p183_p2, %p182_p1 }
   0x9   :  { %p185_p4 = pnand %p184_p3, %p178_p0 }
   0xb   :  { %188 = shalt.err (!%p185_p4)
}
   0xc   :  { %s236_s15 = smov 64   ;;  %s237_s16 = smov 4  }
   0xd   :  { %22 = dma.hbm_to_vmem [thread:$0]  %s276_s0, 128, %s17_s13, [#allocation3], %s236_s15, %s236_s15, %s237_s16  }
   0xe   :  { %s238_s19 = smov [#allocation5]  }
   0xf   :  { %s28_s20 = sshll.u32 %s238_s19, 4  ;;  %s29_s20 = int_to_ptr.vmem [resolvable:$true] %s28_s20 }
  0x10   :  { %s197_s21 = scalar_lea.vmem %s29_s20, 256  ;;  %p202_p6 = scmp.lt.s32.totalorder %s29_s20, %s29_s20 }
  0x11   :  { %p198_p5 = scmp.ne.s32.totalorder %s29_s20, %s197_s21  ;;  %p203_p7 = scmp.lt.s32.totalorder %s197_s21, %s197_s21 }
  0x13   :  { %p204_p8 = por %p203_p7, %p202_p6 }
  0x15   :  { %p205_p9 = pnand %p204_p8, %p198_p5 }
  0x17   :  { %208 = shalt.err (!%p205_p9)
}
  0x18   :  { %34 = dma.hbm_to_vmem [thread:$0]  %s277_s1, 256, %s29_s20, [#allocation6], %s236_s15, %s236_s15, %s237_s16  }
  0x19   :  { %229 = dma.done.wait [#allocation3], 128  }
  0x1a   :  { %230 = vsyncadd [#allocation3], 4294967168 }
  0x1b   :  { %231 = dma.done.wait [#allocation6], 256  }
  0x1c   :  { %232 = vsyncadd [#allocation6], 4294967040  ;;  %v239_v0 = vmov 0.0   ;;  %vm240_vm0 = vmmov 0   ;;  %v166_v1 = vld [vmem:[#allocation5 + $0x8] sm:$0xff]   ;;  %v167_v2 = vld [vmem:[#allocation5] sm:$0xff]  }
  0x1d   :  { %149 = vmatprep.subr.bf16.mxu0 %v239_v0  ;;  %153 = vmatprep.mubr.msk.bf16.mxu0 %vm240_vm0, %v239_v0  ;;  %v168_v3 = vld [vmem:[#allocation2] sm:$0xff]   ;;  %vm74_vm1 = vcmask 261120   ;;  %s241_s1 = smov [#allocation7]  }
  0x1e   :  { %150 = vmatpush3.bf16.msra.mxu0 %v166_v1  ;;  %v141_v4 = vld [vmem:[%s278_s2] ss:$0 sm:$0xff]  ;;  %s128_s25 = sshll.u32 %s241_s1, 4  ;;  %s129_s25 = int_to_ptr.vmem [resolvable:$true] %s128_s25 }
  0x1f   :  { %151 = vmatprep.subr.bf16.mxu0 %v239_v0  ;;  %s209_s26 = scalar_lea.vmem %s129_s25, 256  ;;  %p214_p11 = scmp.lt.s32.totalorder %s129_s25, %s129_s25 }
  0x20   :  { %p210_p10 = scmp.ne.s32.totalorder %s129_s25, %s209_s26  ;;  %p215_p12 = scmp.lt.s32.totalorder %s209_s26, %s209_s26 }
  0x22   :  { %152 = vmatpush3.bf16.msra.mxu0 %v167_v2  ;;  %p216_p13 = por %p215_p12, %p214_p11 }
  0x24   :  { %p217_p0 = pnand %p216_p13, %p210_p10 }
  0x25   :  { %154 = vmatmul.mubr.msk.bf16.vlgmr.msra.gmra.mxu0 %vm74_vm1, %v168_v3 }
  0xe5   :  { %v112_v5 = vpop.f32.mrf.mxu0 }
  0xe6   :  { %v113_v6 = vadd.f32 %v141_v4, %v112_v5 }
  0xe7   :  { %v155_v7 = vpop.f32.mrf.mxu0 }
  0xe8   :  { %v119_v8 = vmax.f32 %v113_v6, 0.0 }
  0xe9   :  { %v115_v9 = vpop.f32.mrf.mxu0 }
  0xea   :  { %121 = vst [vmem:[#allocation7] sm:$0xff] %v119_v8  ;;  %v116_v10 = vadd.f32 %v141_v4, %v115_v9 }
  0xeb   :  { %v156_v11 = vpop.f32.mrf.mxu0 }
  0xec   :  { %v120_v12 = vmax.f32 %v116_v10, 0.0 }
  0xee   :  { %122 = vst [vmem:[#allocation7 + $0x8] sm:$0xff] %v120_v12 }
  0xef   :  { %220 = shalt.err (!%p217_p0)
}
  0xf0   :  { %s242_s2 = smov 128   ;;  %s243_s27 = smov 8  }
  0xf1   :  { %134 = dma.vmem_to_hbm [thread:$0]  %s129_s25, 256, %s279_s3, [#allocation4], %s242_s2, %s242_s2, %s243_s27  }
  0xf2   :  { %233 = dma.done.wait [#allocation4], 256  }
  0xf3   :  { %234 = vsyncadd [#allocation4], 4294967040 }
  0xf4   :  { %138 = vsyncpa [#allocation3], 1 }
  0xf5   :  { %139 = vsyncpa [#allocation6], 1 }
  0xf6   :  { %140 = vsyncpa [#allocation4], 1 }

</bundles_post_ra>
